<compile_context>
chip_gen: v7x
topology: tpu7x:2x2x1
jax: 0.10.0
libtpu: 0.0.40
codegen_flags: <defaults>
</compile_context>

<pallas_src>
import functools

import jax
import jax.numpy as jnp
import numpy as np
from jax import lax
from jax.experimental import pallas as pl
from jax.experimental.pallas import tpu as pltpu


def _round_up(x, m):
    return ((x + m - 1) // m) * m


def _conv_stage_config():
    """Per-TPU-generation conv-stage tile cap + explicit scoped-VMEM budget."""
    kind = ""
    try:
        kind = jax.devices()[0].device_kind.lower()
    except Exception:
        pass
    mib = 1024 * 1024
    if ("v5 lite" in kind) or ("v5e" in kind) or ("v5litepod" in kind):
        # v5e: default scoped VMEM is only 16 MiB -> set an explicit limit;
        # per-step compute is ~5x slower than v6e so step-overhead is not the
        # binding constraint -- keep the tile moderate.
        return dict(n_tile_cap=256, vmem_limit=32 * mib)
    if "v6" in kind:
        # v6e: 128 MiB physical VMEM; enlarge the step so the ~0.35us fixed
        # per-grid-step overhead is <10% of the per-step MXU time.
        return dict(n_tile_cap=1024, vmem_limit=64 * mib)
    if ("v7" in kind) or ("tpu7" in kind):
        # v7x: only 64 MiB VMEM per TensorCore -> smaller cap, leave headroom
        # for the double-buffered input/output blocks.
        return dict(n_tile_cap=512, vmem_limit=48 * mib)
    # unknown generation (v4/v5p/interpret): conservative defaults.
    return dict(n_tile_cap=256, vmem_limit=32 * mib)


# --------------------------- Stage 1: conv + max ----------------------------
def _conv_max_kernel(x_ref, w1_ref, b1_ref, w2_ref, b2_ref, w3_ref, b3_ref,
                     g_ref, *, k, n_valid, n_tile, b_blk, needs_mask):
    ni = pl.program_id(1)
    c_out = w3_ref.shape[-1]

    # resident running-max accumulator (same block index across the
    # "arbitrary" N-tile axis): initialize once per batch block.
    @pl.when(ni == 0)
    def _init():
        g_ref[...] = jnp.full(g_ref.shape, -jnp.inf, dtype=g_ref.dtype)

    # weights loaded once per grid step (constant index maps -> no re-DMA).
    w1 = w1_ref[...]                                   # (k, 64)   f32
    b1 = b1_ref[...]                                   # (1, 64)   f32
    w2 = w2_ref[...]                                   # (64, 128) bf16
    b2 = b2_ref[...]                                   # (1, 128)  f32
    w3 = w3_ref[...]                                   # (128, 1024) bf16
    b3 = b3_ref[...]                                   # (1, 1024) f32

    def _chunk(b, carry):
        xb = x_ref[b]                                  # (n_tile, k) f32
        # conv1 on the VPU: k broadcast FMAs (avoids a K=3 f32 MXU pass and
        # any in-kernel flatten/reshape).
        h = b1
        for c in range(k):
            h = h + xb[:, c:c + 1] * w1[c:c + 1, :]
        h = jnp.maximum(h, 0.0)                        # (n_tile, 64)
        # conv2 / conv3: bf16 operands, f32 accumulation.
        h = jnp.dot(h.astype(w2.dtype), w2,
                    preferred_element_type=jnp.float32) + b2
        h = jnp.maximum(h, 0.0)                        # (n_tile, 128)
        h = jnp.dot(h.astype(w3.dtype), w3,
                    preferred_element_type=jnp.float32) + b3
        h = jnp.maximum(h, 0.0)                        # (n_tile, 1024)
        if needs_mask:
            # padded point rows would contribute relu(bias) > 0 -> mask.
            point = (lax.broadcasted_iota(jnp.int32, (n_tile, 1), 0)
                     + ni * n_tile)
            h = jnp.where(point < n_valid, h, -jnp.inf)
        part = jnp.max(h, axis=0, keepdims=True)       # (1, 1024)
        part = part.reshape(1, 1, c_out)
        cur = g_ref[pl.ds(b, 1)]                       # (1, 1, 1024)
        g_ref[pl.ds(b, 1)] = jnp.maximum(cur, part)
        return carry

    lax.fori_loop(0, b_blk, _chunk, 0, unroll=True)


# ------------------------------ Stage 2: FC ---------------------------------
def _fc_kernel(g_ref, fw1_ref, fb1_ref, fw2_ref, fb2_ref, fw3_ref, fb3_ref,
               iden_ref, out_ref):
    g = g_ref[...]                                     # (b_fc, 1024) f32
    f = (jnp.dot(g.astype(fw1_ref.dtype), fw1_ref[...],
                 preferred_element_type=jnp.float32) + fb1_ref[...])
    f = jnp.maximum(f, 0.0)
    f = (jnp.dot(f.astype(fw2_ref.dtype), fw2_ref[...],
                 preferred_element_type=jnp.float32) + fb2_ref[...])
    f = jnp.maximum(f, 0.0)
    # fc3 stays f32 (tiny); default Mosaic f32 matmul precision is adequate
    # for the 1e-2 tolerance used here.
    f = (jnp.dot(f, fw3_ref[...], preferred_element_type=jnp.float32)
         + fb3_ref[...] + iden_ref[...])               # (b_fc, k*k)
    out_ref[...] = f


# ------------------------------- parameters ---------------------------------
def init_params(key, k=3):
    """Deterministic synthetic params (PyTorch-style uniform(-1/sqrt(fan_in))).

    Weights are stored as (fan_in, fan_out) = transposed vs. PyTorch's layout.
    """
    dims = [(k, 64), (64, 128), (128, 1024), (1024, 512), (512, 256), (256, k * k)]
    params = []
    for fan_in, fan_out in dims:
        key, wk, bk = jax.random.split(key, 3)
        bound = 1.0 / float(np.sqrt(fan_in))
        w = jax.random.uniform(wk, (fan_in, fan_out), jnp.float32, -bound, bound)
        b = jax.random.uniform(bk, (1, fan_out), jnp.float32, -bound, bound)
        params.append((w, b))
    return params


# --------------------------------- wrapper ----------------------------------
def stnkd_forward(x_ncw, params, k=3, matmul_dtype=jnp.bfloat16, n_tile=None):
    """x_ncw: (B, k, N) float32 (PyTorch Conv1d NCW layout). Returns (B, k, k)."""
    B, C, N = x_ncw.shape
    assert C == k
    assert k == 3, "module's `iden = eye(3).view(9)` buffer forces k == 3"

    (w1, b1), (w2, b2), (w3, b3), (fw1, fb1), (fw2, fb2), (fw3, fb3) = params
    c_hidden = w3.shape[1]                             # 1024
    kk = k * k

    cfg = _conv_stage_config()

    # big-matmul weights in bf16 (f32 accumulation); conv1/fc3 stay f32.
    w2c, w3c, fw1c, fw2c = (w.astype(matmul_dtype) for w in (w2, w3, fw1, fw2))

    # NWC activations so every matmul's lane dim is the (dense) channel dim;
    # the one-off XLA transpose over x costs ~B*N*k*8 bytes of HBM traffic.
    x = jnp.transpose(x_ncw, (0, 2, 1)).astype(jnp.float32)   # (B, N, k)

    # ---- conv-stage tiling ----
    if n_tile is None:
        n_tile = min(cfg["n_tile_cap"], _round_up(N, 8))
    n_tile = _round_up(n_tile, 8)
    n_pad = _round_up(N, n_tile)
    # invariant: every N tile contains >= 1 valid point, so g never holds -inf
    # for a real batch row (padded batch rows are sliced off at the end).
    assert n_pad - n_tile < N

    # >= 2 batch blocks whenever B >= 2 so v7x's two TensorCores both get real
    # work; conv-stage padding waste is bounded by b_blk - 1 <= 7 rows.
    b_blk = 8 if B >= 16 else max(1, (B + 1) // 2)
    b_pad = _round_up(B, b_blk)

    if (b_pad, n_pad) != (B, N):
        x = jnp.pad(x, ((0, b_pad - B), (0, n_pad - N), (0, 0)))

    def _bytes(*arrays):
        return sum(int(a.size) * a.dtype.itemsize for a in arrays)

    # ----------------- stage 1: conv1-3 + masked running max ----------------
    conv_grid = (b_pad // b_blk, n_pad // n_tile)

    def const_spec2(shape):                            # constant index map (2-D grid)
        return pl.BlockSpec(shape, lambda bi, ni: (0,) * len(shape))

    conv_kernel = functools.partial(
        _conv_max_kernel, k=k, n_valid=N, n_tile=n_tile, b_blk=b_blk,
        needs_mask=(n_pad != N))

    conv_cost = pl.CostEstimate(
        flops=2 * b_pad * n_pad * (k * 64 + 64 * 128 + 128 * c_hidden),
        transcendentals=0,
        bytes_accessed=int(b_pad * n_pad * k * 4
                           + _bytes(w1, b1, w2c, b2, w3c, b3)
                           + b_pad * c_hidden * 4))

    g = pl.pallas_call(
        conv_kernel,
        out_shape=jax.ShapeDtypeStruct((b_pad, 1, c_hidden), jnp.float32),
        grid_spec=pltpu.PrefetchScalarGridSpec(
            num_scalar_prefetch=0,
            grid=conv_grid,
            in_specs=[
                pl.BlockSpec((b_blk, n_tile, k), lambda bi, ni: (bi, ni, 0)),
                const_spec2(w1.shape), const_spec2(b1.shape),
                const_spec2(w2c.shape), const_spec2(b2.shape),
                const_spec2(w3c.shape), const_spec2(b3.shape),
            ],
            out_specs=pl.BlockSpec((b_blk, 1, c_hidden),
                                   lambda bi, ni: (bi, 0, 0)),
        ),
        compiler_params=pltpu.CompilerParams(
            dimension_semantics=("parallel", "arbitrary"),
            vmem_limit_bytes=int(cfg["vmem_limit"])),
        cost_estimate=conv_cost,
    )(x, w1, b1, w2c, b2, w3c, b3)

    # --------------------- stage 2: batched fc1/fc2/fc3 ---------------------
    # FC-stage batch padding is decoupled from the conv-stage padding.
    b_fc = min(256, _round_up(B, 8))
    b_fc_pad = _round_up(B, b_fc)

    g2 = g.reshape(b_pad, c_hidden)[:B]
    if b_fc_pad != B:
        g2 = jnp.pad(g2, ((0, b_fc_pad - B), (0, 0)))

    iden = jnp.eye(3, dtype=jnp.float32).reshape(1, kk)

    def const_spec1(shape):                            # constant index map (1-D grid)
        return pl.BlockSpec(shape, lambda bi: (0,) * len(shape))

    fc_cost = pl.CostEstimate(
        flops=2 * b_fc_pad * (c_hidden * 512 + 512 * 256 + 256 * kk),
        transcendentals=0,
        bytes_accessed=int(b_fc_pad * c_hidden * 4
                           + _bytes(fw1c, fb1, fw2c, fb2, fw3, fb3, iden)
                           + b_fc_pad * kk * 4))

    out = pl.pallas_call(
        _fc_kernel,
        out_shape=jax.ShapeDtypeStruct((b_fc_pad, kk), jnp.float32),
        grid_spec=pltpu.PrefetchScalarGridSpec(
            num_scalar_prefetch=0,
            grid=(b_fc_pad // b_fc,),
            in_specs=[
                pl.BlockSpec((b_fc, c_hidden), lambda bi: (bi, 0)),
                const_spec1(fw1c.shape), const_spec1(fb1.shape),
                const_spec1(fw2c.shape), const_spec1(fb2.shape),
                const_spec1(fw3.shape), const_spec1(fb3.shape),
                const_spec1(iden.shape),
            ],
            out_specs=pl.BlockSpec((b_fc, kk), lambda bi: (bi, 0)),
        ),
        compiler_params=pltpu.CompilerParams(
            dimension_semantics=("parallel",),
            vmem_limit_bytes=int(cfg["vmem_limit"])),
        cost_estimate=fc_cost,
    )(g2, fw1c, fb1, fw2c, fb2, fw3, fb3, iden)

    return out[:B].reshape(B, k, k)


# ------------------------------ JAX reference --------------------------------
def stnkd_reference(x_ncw, params, k=3, matmul_dtype=jnp.bfloat16):
    """Plain-JAX reference mirroring the PyTorch forward (same bf16 matmul
    numerics as the kernel: bf16 operands, f32 accumulation)."""
    (w1, b1), (w2, b2), (w3, b3), (fw1, fb1), (fw2, fb2), (fw3, fb3) = params
    hi = jax.lax.Precision.HIGHEST
    x = jnp.transpose(x_ncw, (0, 2, 1))                         # (B, N, k)
    h = jax.nn.relu(jnp.dot(x, w1, precision=hi,
                            preferred_element_type=jnp.float32) + b1)
    h = jax.nn.relu(jnp.dot(h.astype(matmul_dtype), w2.astype(matmul_dtype),
                            preferred_element_type=jnp.float32) + b2)
    h = jax.nn.relu(jnp.dot(h.astype(matmul_dtype), w3.astype(matmul_dtype),
                            preferred_element_type=jnp.float32) + b3)
    g = jnp.max(h, axis=1)                                      # (B, 1024)
    f = jax.nn.relu(jnp.dot(g.astype(matmul_dtype), fw1.astype(matmul_dtype),
                            preferred_element_type=jnp.float32) + fb1)
    f = jax.nn.relu(jnp.dot(f.astype(matmul_dtype), fw2.astype(matmul_dtype),
                            preferred_element_type=jnp.float32) + fb2)
    f = (jnp.dot(f, fw3, precision=hi, preferred_element_type=jnp.float32)
         + fb3 + jnp.eye(3, dtype=jnp.float32).reshape(1, 9))
    return f.reshape(-1, k, k)


if __name__ == "__main__":
    k = 3            # forced by the module's `iden = eye(3).view(9)` buffer
    key = jax.random.PRNGKey(0)
    pkey, xkey = jax.random.split(key)
    params = init_params(pkey, k)

    # small shapes consistent with the module: x is (B, k, N) NCW like Conv1d
    B, N = 2, 16
    x = jax.random.normal(xkey, (B, k, N), dtype=jnp.float32)
    out = jax.block_until_ready(stnkd_forward(x, params, k))
    assert out.shape == (B, k, k) and out.dtype == jnp.float32
    ref = stnkd_reference(x, params, k)
    np.testing.assert_allclose(np.asarray(out), np.asarray(ref), rtol=1e-2, atol=1e-2)

    # exercise batch/point padding + the masked max (N not a multiple of 8,
    # b_blk = 2 with one padded batch row)
    B2, N2 = 3, 20
    x2 = jax.random.normal(jax.random.PRNGKey(1), (B2, k, N2), dtype=jnp.float32)
    out2 = jax.block_until_ready(stnkd_forward(x2, params, k))
    np.testing.assert_allclose(np.asarray(out2),
                               np.asarray(stnkd_reference(x2, params, k)),
                               rtol=1e-2, atol=1e-2)

    # exercise the multi-N-tile running-max path (3 tiles, last tile masked)
    B3, N3 = 2, 40
    x3 = jax.random.normal(jax.random.PRNGKey(2), (B3, k, N3), dtype=jnp.float32)
    out3 = jax.block_until_ready(stnkd_forward(x3, params, k, n_tile=16))
    np.testing.assert_allclose(np.asarray(out3),
                               np.asarray(stnkd_reference(x3, params, k)),
                               rtol=1e-2, atol=1e-2)

    print("KERNEL_OK")
</pallas_src>

<mosaic_0001>
module attributes {stable_mosaic.version = 11 : i64} {
  func.func @_conv_max_kernel(%arg0: i32, %arg1: i32, %arg2: memref<1x16x3xf32, #tpu.memory_space<vmem>>, %arg3: memref<3x64xf32, #tpu.memory_space<vmem>>, %arg4: memref<1x64xf32, #tpu.memory_space<vmem>>, %arg5: memref<64x128xbf16, #tpu.memory_space<vmem>>, %arg6: memref<1x128xf32, #tpu.memory_space<vmem>>, %arg7: memref<128x1024xbf16, #tpu.memory_space<vmem>>, %arg8: memref<1x1024xf32, #tpu.memory_space<vmem>>, %arg9: memref<1x1x1024xf32, #tpu.memory_space<vmem>>) attributes {dimension_semantics = [#tpu.dimension_semantics<parallel>, #tpu.dimension_semantics<arbitrary>], iteration_bounds = array<i64: 2, 1>, scalar_prefetch = 0 : i64, scratch_operands = 0 : i64, tpu.core_type = #tpu.core_type<tc>, window_params = [{transform_indices = @transform_0, window_bounds = array<i64: 1, 16, 3>}, {pipeline_mode = #tpu.pipeline_mode<synchronous>, transform_indices = @transform_1, window_bounds = array<i64: 3, 64>}, {pipeline_mode = #tpu.pipeline_mode<synchronous>, transform_indices = @transform_2, window_bounds = array<i64: 1, 64>}, {pipeline_mode = #tpu.pipeline_mode<synchronous>, transform_indices = @transform_3, window_bounds = array<i64: 64, 128>}, {pipeline_mode = #tpu.pipeline_mode<synchronous>, transform_indices = @transform_4, window_bounds = array<i64: 1, 128>}, {pipeline_mode = #tpu.pipeline_mode<synchronous>, transform_indices = @transform_5, window_bounds = array<i64: 128, 1024>}, {pipeline_mode = #tpu.pipeline_mode<synchronous>, transform_indices = @transform_6, window_bounds = array<i64: 1, 1024>}, {transform_indices = @transform_7, window_bounds = array<i64: 1, 1, 1024>}]} {
    %c0_i32 = arith.constant 0 : i32
    %0 = arith.cmpi eq, %arg1, %c0_i32 : i32
    %1 = arith.extui %0 : i1 to i32
    %c0_i32_0 = arith.constant 0 : i32
    %2 = arith.cmpi ne, %1, %c0_i32_0 : i32
    scf.if %2 {
      %cst_24 = arith.constant 0xFF800000 : f32
      %53 = vector.broadcast %cst_24 : f32 to vector<1x1x1024xf32>
      %c0_25 = arith.constant 0 : index
      %c0_26 = arith.constant 0 : index
      %c0_27 = arith.constant 0 : index
      %54 = vector.load %arg9[%c0_25, %c0_26, %c0_27] : memref<1x1x1024xf32, #tpu.memory_space<vmem>>, vector<1x1x1024xf32>
      tpu.vector_store %arg9[%c0_25, %c0_26, %c0_27], %53 {strides = array<i32>} : memref<1x1x1024xf32, #tpu.memory_space<vmem>>, vector<1x1x1024xf32>,
    } else {
    }
    %c0 = arith.constant 0 : index
    %c0_1 = arith.constant 0 : index
    %3 = vector.load %arg3[%c0, %c0_1] : memref<3x64xf32, #tpu.memory_space<vmem>>, vector<3x64xf32>
    %c0_2 = arith.constant 0 : index
    %c0_3 = arith.constant 0 : index
    %4 = vector.load %arg4[%c0_2, %c0_3] : memref<1x64xf32, #tpu.memory_space<vmem>>, vector<1x64xf32>
    %c0_4 = arith.constant 0 : index
    %c0_5 = arith.constant 0 : index
    %5 = vector.load %arg5[%c0_4, %c0_5] : memref<64x128xbf16, #tpu.memory_space<vmem>>, vector<64x128xbf16>
    %c0_6 = arith.constant 0 : index
    %c0_7 = arith.constant 0 : index
    %6 = vector.load %arg6[%c0_6, %c0_7] : memref<1x128xf32, #tpu.memory_space<vmem>>, vector<1x128xf32>
    %c0_8 = arith.constant 0 : index
    %c0_9 = arith.constant 0 : index
    %7 = vector.load %arg7[%c0_8, %c0_9] : memref<128x1024xbf16, #tpu.memory_space<vmem>>, vector<128x1024xbf16>
    %c0_10 = arith.constant 0 : index
    %c0_11 = arith.constant 0 : index
    %8 = vector.load %arg8[%c0_10, %c0_11] : memref<1x1024xf32, #tpu.memory_space<vmem>>, vector<1x1024xf32>
    %c0_i32_12 = arith.constant 0 : i32
    %9 = arith.index_cast %c0_i32_12 : i32 to index
    %c0_13 = arith.constant 0 : index
    %c0_14 = arith.constant 0 : index
    %10 = vector.load %arg2[%9, %c0_13, %c0_14] : memref<1x16x3xf32, #tpu.memory_space<vmem>>, vector<1x16x3xf32>
    %11 = vector.shape_cast %10 : vector<1x16x3xf32> to vector<16x3xf32>
    %12 = vector.extract_strided_slice %11 {offsets = [0, 0], sizes = [16, 1], strides = [1, 1]} : vector<16x3xf32> to vector<16x1xf32>
    %13 = vector.extract_strided_slice %3 {offsets = [0, 0], sizes = [1, 64], strides = [1, 1]} : vector<3x64xf32> to vector<1x64xf32>
    %14 = vector.broadcast %12 : vector<16x1xf32> to vector<16x64xf32>
    %15 = vector.broadcast %13 : vector<1x64xf32> to vector<16x64xf32>
    %16 = arith.mulf %14, %15 : vector<16x64xf32>
    %17 = vector.broadcast %4 : vector<1x64xf32> to vector<16x64xf32>
    %18 = arith.addf %17, %16 : vector<16x64xf32>
    %19 = vector.extract_strided_slice %11 {offsets = [0, 1], sizes = [16, 1], strides = [1, 1]} : vector<16x3xf32> to vector<16x1xf32>
    %20 = vector.extract_strided_slice %3 {offsets = [1, 0], sizes = [1, 64], strides = [1, 1]} : vector<3x64xf32> to vector<1x64xf32>
    %21 = vector.broadcast %19 : vector<16x1xf32> to vector<16x64xf32>
    %22 = vector.broadcast %20 : vector<1x64xf32> to vector<16x64xf32>
    %23 = arith.mulf %21, %22 : vector<16x64xf32>
    %24 = arith.addf %18, %23 : vector<16x64xf32>
    %25 = vector.extract_strided_slice %11 {offsets = [0, 2], sizes = [16, 1], strides = [1, 1]} : vector<16x3xf32> to vector<16x1xf32>
    %26 = vector.extract_strided_slice %3 {offsets = [2, 0], sizes = [1, 64], strides = [1, 1]} : vector<3x64xf32> to vector<1x64xf32>
    %27 = vector.broadcast %25 : vector<16x1xf32> to vector<16x64xf32>
    %28 = vector.broadcast %26 : vector<1x64xf32> to vector<16x64xf32>
    %29 = arith.mulf %27, %28 : vector<16x64xf32>
    %30 = arith.addf %24, %29 : vector<16x64xf32>
    %cst = arith.constant 0.000000e+00 : f32
    %31 = vector.broadcast %cst : f32 to vector<16x64xf32>
    %32 = arith.maximumf %30, %31 : vector<16x64xf32>
    %33 = arith.truncf %32 : vector<16x64xf32> to vector<16x64xbf16>
    %cst_15 = arith.constant dense<0.000000e+00> : vector<16x128xf32>
    %34 = tpu.matmul %33, %5, %cst_15 {dimension_numbers = #tpu.dot_dimension_numbers<[1], [0], [0], [1], [0, 0, 1, 1], [], []>} : vector<16x64xbf16>, vector<64x128xbf16>, vector<16x128xf32> -> vector<16x128xf32>
    %35 = vector.broadcast %6 : vector<1x128xf32> to vector<16x128xf32>
    %36 = arith.addf %34, %35 : vector<16x128xf32>
    %cst_16 = arith.constant 0.000000e+00 : f32
    %37 = vector.broadcast %cst_16 : f32 to vector<16x128xf32>
    %38 = arith.maximumf %36, %37 : vector<16x128xf32>
    %39 = arith.truncf %38 : vector<16x128xf32> to vector<16x128xbf16>
    %cst_17 = arith.constant dense<0.000000e+00> : vector<16x1024xf32>
    %40 = tpu.matmul %39, %7, %cst_17 {dimension_numbers = #tpu.dot_dimension_numbers<[1], [0], [0], [1], [0, 0, 1, 1], [], []>} : vector<16x128xbf16>, vector<128x1024xbf16>, vector<16x1024xf32> -> vector<16x1024xf32>
    %41 = vector.broadcast %8 : vector<1x1024xf32> to vector<16x1024xf32>
    %42 = arith.addf %40, %41 : vector<16x1024xf32>
    %cst_18 = arith.constant 0.000000e+00 : f32
    %43 = vector.broadcast %cst_18 : f32 to vector<16x1024xf32>
    %44 = arith.maximumf %42, %43 : vector<16x1024xf32>
    %cst_19 = arith.constant dense<0xFF800000> : vector<1024xf32>
    %45 = vector.multi_reduction <maximumf>, %44, %cst_19 [0] : vector<16x1024xf32> to vector<1024xf32>
    %46 = vector.shape_cast %45 : vector<1024xf32> to vector<1x1024xf32>
    %47 = vector.shape_cast %46 : vector<1x1024xf32> to vector<1x1x1024xf32>
    %48 = arith.index_cast %c0_i32_12 : i32 to index
    %c0_20 = arith.constant 0 : index
    %c0_21 = arith.constant 0 : index
    %49 = vector.load %arg9[%48, %c0_20, %c0_21] : memref<1x1x1024xf32, #tpu.memory_space<vmem>>, vector<1x1x1024xf32>
    %50 = arith.maximumf %49, %47 : vector<1x1x1024xf32>
    %51 = arith.index_cast %c0_i32_12 : i32 to index
    %c0_22 = arith.constant 0 : index
    %c0_23 = arith.constant 0 : index
    %52 = vector.load %arg9[%51, %c0_22, %c0_23] : memref<1x1x1024xf32, #tpu.memory_space<vmem>>, vector<1x1x1024xf32>
    tpu.vector_store %arg9[%51, %c0_22, %c0_23], %50 {strides = array<i32>} : memref<1x1x1024xf32, #tpu.memory_space<vmem>>, vector<1x1x1024xf32>,
    %c1_i32 = arith.constant 1 : i32
    return
  }
  func.func @transform_0(%arg0: i32, %arg1: i32) -> (i32, i32, i32) {
    %c0_i32 = arith.constant 0 : i32
    %c0_i32_0 = arith.constant 0 : i32
    return %arg0, %arg1, %c0_i32 : i32, i32, i32
  }
  func.func @transform_1(%arg0: i32, %arg1: i32) -> (i32, i32) {
    %c0_i32 = arith.constant 0 : i32
    %c0_i32_0 = arith.constant 0 : i32
    %c0_i32_1 = arith.constant 0 : i32
    return %c0_i32, %c0_i32_0 : i32, i32
  }
  func.func @transform_2(%arg0: i32, %arg1: i32) -> (i32, i32) {
    %c0_i32 = arith.constant 0 : i32
    %c0_i32_0 = arith.constant 0 : i32
    %c0_i32_1 = arith.constant 0 : i32
    return %c0_i32, %c0_i32_0 : i32, i32
  }
  func.func @transform_3(%arg0: i32, %arg1: i32) -> (i32, i32) {
    %c0_i32 = arith.constant 0 : i32
    %c0_i32_0 = arith.constant 0 : i32
    %c0_i32_1 = arith.constant 0 : i32
    return %c0_i32, %c0_i32_0 : i32, i32
  }
  func.func @transform_4(%arg0: i32, %arg1: i32) -> (i32, i32) {
    %c0_i32 = arith.constant 0 : i32
    %c0_i32_0 = arith.constant 0 : i32
    %c0_i32_1 = arith.constant 0 : i32
    return %c0_i32, %c0_i32_0 : i32, i32
  }
  func.func @transform_5(%arg0: i32, %arg1: i32) -> (i32, i32) {
    %c0_i32 = arith.constant 0 : i32
    %c0_i32_0 = arith.constant 0 : i32
    %c0_i32_1 = arith.constant 0 : i32
    return %c0_i32, %c0_i32_0 : i32, i32
  }
  func.func @transform_6(%arg0: i32, %arg1: i32) -> (i32, i32) {
    %c0_i32 = arith.constant 0 : i32
    %c0_i32_0 = arith.constant 0 : i32
    %c0_i32_1 = arith.constant 0 : i32
    return %c0_i32, %c0_i32_0 : i32, i32
  }
  func.func @transform_7(%arg0: i32, %arg1: i32) -> (i32, i32, i32) {
    %c0_i32 = arith.constant 0 : i32
    %c0_i32_0 = arith.constant 0 : i32
    %c0_i32_1 = arith.constant 0 : i32
    return %arg0, %c0_i32, %c0_i32_0 : i32, i32, i32
  }
}

</mosaic_0001>

<bundles_post_ra>
// kernel: tpu_custom_call.1
= control target key start
LH: loop header
LB: loop body
LE: loop exit
PB: predicated region body
PF: predicated region fallthrough
CT: control target
= control target key end

     0   :  { %12 = vsyncpa [#allocation3], 0  ;;  %s1903_s0 = inlined_call_operand.vmem [shape: f32[2,16,3], index: 0, kind: input, shape index: {}]   ;;  %s1904_s1 = inlined_call_operand.vmem [shape: f32[3,64], index: 1, kind: input, shape index: {}]   ;;  %s1905_s2 = inlined_call_operand.vmem [shape: f32[1,64], index: 2, kind: input, shape index: {}]   ;;  %s1906_s3 = inlined_call_operand.vmem [shape: bf16[64,128], index: 3, kind: input, shape index: {}]   ;;  %s1907_s4 = inlined_call_operand.vmem [shape: f32[1,128], index: 4, kind: input, shape index: {}]   ;;  %s1908_s5 = inlined_call_operand.hbm [shape: bf16[128,1024], index: 5, kind: input, shape index: {}]   ;;  %s1909_s6 = inlined_call_operand.vmem [shape: f32[1,1024], index: 6, kind: input, shape index: {}]   ;;  %s1910_s7 = inlined_call_operand.hbm [shape: f32[2,1,1024], index: 7, kind: output, shape index: {}]  }
   0x1   :  { %13 = vsyncpa [#allocation4], 0 }
   0x2   :  { %15 = vsyncpa [#allocation4 + $0x1], 0  ;;  %s1657_s24 = smov 0   ;;  %s1659_s25 = smov 0  }
   0x3   :  { %s1661_s26 = smov 0   ;;  %s1663_s27 = smov 0  }
   0x4   :  { %s1665_s28 = smov 0   ;;  %s1667_s29 = smov 0  }
   0x5 LB: > { %s1307_s30 = sadd.s32 4294967295, %s1605_s29   ;;  %s1308_s8 = sadd.s32 4294967294, %s1605_s29   ;;  %s1605_s29 = sphi %s1667_s29, %s21_s29   ;;  %s1601_s28 = sphi %s1665_s28, %s1928_s28   ;;  %s1597_s27 = sphi %s1663_s27, %s1927_s27   ;;  %s1593_s26 = sphi %s1661_s26, %s1926_s26   ;;  %s1589_s25 = sphi %s1659_s25, %s1925_s25   ;;  %s1585_s24 = sphi %s1657_s24, %s1924_s24  }
   0x6   : > { %s33_s9 = sadd.s32 1, %s1601_s28  ;;  %s194_s10 = sadd.s32 1, %s1593_s26 }
   0x7   : > { %p35_p0 = scmp.ge.s32.totalorder %s33_s9, 2  ;;  %p204_p1 = scmp.ne.s32.totalorder %s1593_s26, %s1589_s25 }
   0x8   : > { %p205_p2 = scmp.eq.s32.totalorder %s1307_s30, 1  ;;  %p210_p3 = scmp.ne.s32.totalorder %s1589_s25, %s1585_s24 }
   0x9   : > { %s1930_s9 = smov (%p35_p0, %s33_s9), 0  ;;  %p211_p5 = scmp.eq.s32.totalorder %s1308_s8, 1 }
   0xa   : > { %p1697_p4 = por %p205_p2, %p204_p1  ;;  %s191_s12 = ssub.s32 %s1601_s28, %s1930_s9 }
   0xb   : > { %p1309_p6 = scmp.ge.s32.totalorder %s1605_s29, 1  ;;  %p192_p7 = scmp.eq.s32.totalorder %s191_s12, 0 }
   0xc   : > { %s1915_s11 = scalar_select %p1697_p4, 1, 0 }
   0xd   : > { %p1704_p8 = por %p211_p5, %p210_p3  ;;  %p218_p9 = scmp.lt.s32.totalorder %s1605_s29, 3 }
   0xe   : > { %s1710_s14 = scalar_select %p192_p7, %s1593_s26, %s194_s10  }
   0xf   : > { %s1916_s13 = scalar_select %p1704_p8, 1, 0 }
  0x10   : > { %p1712_p10 = pnand %p1309_p6, %p218_p9  ;;  %p1716_p11 = scmp.eq.s32.totalorder %s1307_s30, 0 }
  0x11   : > { %s1607_s17 = smov [#allocation2]   ;;  %s1495_s22 = scalar_lea.hbm %s1908_s5, 8192 }
  0x12   : > { %s1917_s15 = scalar_select %p1712_p10, 1, 0 }
  0x13   : > { %s1918_s16 = scalar_select %p1716_p11, 1, 0 }
  0x14   : > { %p1418_p12 = pneg %p1712_p10  ;;  %s242_s18 = sshll.u32 %s1607_s17, 4  ;;  %s243_s18 = int_to_ptr.vmem [resolvable:$true] %s242_s18 }
  0x15   : > { %p1496_p0 = scmp.ne.s32.totalorder %s1908_s5, %s1495_s22  ;;  %p1502_p5 = scmp.lt.u32.totalorder %s1495_s22, %s1908_s5 }
  0x16   : > { %p1724_p13 = pnand %p1716_p11, %p1418_p12 }
  0x18   : > { %p1497_p1 = pneg %p1724_p13 }
  0x1a   : > { %p1498_p2 = pnand %p1497_p1, %p1496_p0 }
  0x1c   : > { %p1499_p3 = pneg %p1498_p2 }
  0x1e   : > { %p1504_p6 = pnand %p1502_p5, %p1499_p3 }
  0x20   : > { %1507 = shalt.err (!%p1504_p6)
}
  0x21   : > { %s1508_s12 = scalar_lea.vmem %s243_s18, 8192  ;;  %p1516_p8 = scmp.lt.s32.totalorder %s243_s18, %s243_s18 }
  0x22   : > { %p1509_p7 = scmp.ne.s32.totalorder %s243_s18, %s1508_s12  ;;  %p1517_p4 = scmp.lt.s32.totalorder %s1508_s12, %s1508_s12 }
  0x24   : > { %p1511_p9 = pnand %p1509_p7, %p1497_p1  ;;  %p1518_p11 = por %p1517_p4, %p1516_p8 }
  0x26   : > { %p1512_p12 = pneg %p1511_p9 }
  0x28   : > { %p1519_p10 = pnand %p1518_p11, %p1512_p12 }
  0x2a   : > { %1522 = shalt.err (!%p1519_p10)
}
  0x2b   : > { %s1608_s17 = smov 512   ;;  %s1609_s20 = smov 32  }
  0x2c   : > { %1421 = dma.hbm_to_vmem [thread:$0]  (!%p1724_p13), %s1908_s5, 8192, %s243_s18, [#allocation3], %s1608_s17, %s1608_s17, %s1609_s20  }
  0x2d   : > { %p1920_p0 = scmp.ne.s32.totalorder %s1917_s15, 0 }
  0x2e   : > { %p1921_p2 = scmp.ne.s32.totalorder (!%p1920_p0), %s1918_s16, 0 }
  0x2f   : > { %274 = sbr.rel (%p1920_p0) target bundleno = 716 (0x2cc), region = 48 }
  0x36   : > { %1576 = dma.done.wait (%p1921_p2), [#allocation3], 8192  }
  0x37   : > { %1578 = vsyncadd (%p1921_p2), [#allocation3], 4294959104  ;;  %p311_p4 = scmp.lt.s32.totalorder %s1597_s27, 1  ;;  %v1610_v0 = vmov 1   ;;  %v1611_v1 = vmov 0   ;;  %v1491_v4 = vld [vmem:[%s1906_s3] sm:$0xff]   ;;  %v414_v38 = vlaneseq }
  0x38   : > { %1488 = vset.pattern.permute.xlu1 %v1610_v0  ;;  %1487 = vset.pattern.permute.xlu0 %v1611_v1  ;;  %v1612_v5 = vmov 0.0   ;;  %v1492_v6 = vld [vmem:[%s1906_s3 + $0x8] sm:$0xff]   ;;  %v1613_v7 = vmov 2   ;;  %v1493_v8 = vld [vmem:[%s1906_s3 + $0x10] sm:$0xff]   ;;  %v1494_v9 = vld [vmem:[%s1906_s3 + $0x18] sm:$0xff]   ;;  %vm1614_vm0 = vmmov 0  }
  0x39   : > { %s312_s19 = scalar_select %p311_p4, %s1597_s27, 1  ;;  %934 = vmatprep.mubr.bf16.mxu1 %v1611_v1  ;;  %1400 = vmatprep.subr.bf16.mxu0 %v1612_v5  ;;  %v337_v10 = vld [vmem:[#allocation2] sm:$0xff]  ;;  %v1769_v12 = vld [vmem:[#allocation2 + $0x8] sm:$0xff]  ;;  %v1777_v39 = vshrl.u32 %v414_v38, 7  ;;  %vm493_vm1 = vcmask 523264  }
  0x3a   : > { %1401 = vmatpush3.bf16.msra.mxu0 %v1491_v4  ;;  %1408 = vmatprep.mubr.msk.bf16.mxu0 %vm1614_vm0, %v1612_v5  ;;  %v341_v11 = vld [vmem:[#allocation2 + $0x20] sm:$0xff]  ;;  %v1771_v14 = vld [vmem:[#allocation2 + $0x28] sm:$0xff]  ;;  %s307_s12 = sand.u32 1, %s1589_s25   ;;  %s1394_s20 = sshll.u32 %s1597_s27, 7 }
  0x3b   : > { %s1393_s18 = sshll.u32 %s312_s19, 4  ;;  %1402 = vmatprep.subr.bf16.mxu0 %v1612_v5  ;;  %v1325_v13 = vcombine.high %v337_v10, %v341_v11  ;;  %v1324_v15 = vcombine.low %v337_v10, %v341_v11  ;;  %v345_v16 = vld [vmem:[#allocation2 + $0x40] sm:$0xff]  ;;  %v1326_v18 = vcombine.low %v1769_v12, %v1771_v14  ;;  %v1327_v19 = vcombine.high %v1769_v12, %v1771_v14  ;;  %v350_v4 = vld [vmem:[#allocation2 + $0x68] sm:$0xff]  ;;  %s1314_s17 = sshll.u32 %s307_s12, 3 }
  0x3c   : > { %s318_s30 = scalar_lea.vmem %s1903_s0, %s1393_s18  ;;  %v349_v17 = vld [vmem:[#allocation2 + $0x60] sm:$0xff]  ;;  %v416_v40 = vsub.s32 0, %v1777_v39  ;;  %v438_v43 = vsub.s32 1, %v1777_v39  ;;  %v454_v47 = vsub.s32 2, %v1777_v39  ;;  %v358_v10 = vld [vmem:[#allocation2 + $0xa8] sm:$0xff]  ;;  %s309_s21 = scalar_lea.vmem [#allocation5], %s1314_s17 }
  0x3d   : > { %v402_v2 = vld [vmem:[%s318_s30] sm:$0xff]  ;;  %v403_v3 = vld [vmem:[%s318_s30 + $0x8] sm:$0xff]  ;;  %v1333_v20 = vcombine.high %v345_v16, %v349_v17  ;;  %902 = vmatprep.subr.bf16.mxu1 %v1325_v13  ;;  %v1332_v21 = vcombine.low %v345_v16, %v349_v17  ;;  %s1222_s23 = sshll.u32 %s309_s21, 4  ;;  %s1856_s15 = scalar_lea.hbm %s1910_s7, %s1394_s20  ;;  %s1858_s23 = int_to_ptr.vmem [resolvable:$true] %s1222_s23 }
  0x3e   : > { %429 = vperm.xlu1 %1488, %v402_v2   ;;  %406 = vperm.xlu0 %1487, %v402_v2   ;;  %v353_v22 = vld [vmem:[#allocation2 + $0x80] sm:$0xff]  ;;  %v366_v16 = vld [vmem:[#allocation2 + $0xe8] sm:$0xff]  ;;  %s1208_s22 = scalar_lea.sflag [#allocation4], %s307_s12  ;;  %s1523_s30 = scalar_lea.vmem %s1858_s23, 128 }
  0x3f   : > { %1403 = vmatpush3.bf16.msra.mxu0 %v1492_v6  ;;  %903 = vmatpush1.bf16.msra.mxu1 %v1324_v15  ;;  %v357_v23 = vld [vmem:[#allocation2 + $0xa0] sm:$0xff]  ;;  %v362_v15 = vld [vmem:[#allocation2 + $0xc8] sm:$0xff]  ;;  %p1524_p8 = scmp.ne.s32.totalorder %s1858_s23, %s1523_s30  ;;  %p1922_p10 = scmp.ne.s32.totalorder %s1915_s11, 0 }
  0x40   : > { %1404 = vmatprep.subr.bf16.mxu0 %v1612_v5  ;;  %904 = vmatprep.subr.bf16.mxu1 %v1333_v20  ;;  %v1341_v24 = vcombine.high %v353_v22, %v357_v23  ;;  %v1340_v25 = vcombine.low %v353_v22, %v357_v23  ;;  %v361_v26 = vld [vmem:[#allocation2 + $0xc0] sm:$0xff]  ;;  %v370_v20 = vld [vmem:[#allocation2 + $0x108] sm:$0xff]  ;;  %v1350_v22 = vcombine.low %v362_v15, %v366_v16  ;;  %s1616_s27 = smov [#allocation5]  }
  0x41   : > { %v365_v27 = vld [vmem:[#allocation2 + $0xe0] sm:$0xff]  ;;  %v382_v12 = vld [vmem:[#allocation2 + $0x168] sm:$0xff]  ;;  %p1525_p11 = pnand %p1524_p8, %p1922_p10  ;;  %s1527_s16 = sshll.u32 %s1616_s27, 4  ;;  %s1528_s16 = int_to_ptr.vmem [resolvable:$false] %s1527_s16 }
  0x42   : > { %433 = vperm.xlu1 %1488, %v403_v3   ;;  %411 = vperm.xlu0 %1487, %v403_v3   ;;  %v1349_v28 = vcombine.high %v361_v26, %v365_v27  ;;  %v1348_v29 = vcombine.low %v361_v26, %v365_v27  ;;  %v369_v30 = vld [vmem:[#allocation2 + $0x100] sm:$0xff]  ;;  %v398_v38 = vld [vmem:[#allocation2 + $0x1e8] sm:$0xff]  ;;  %s1529_s8 = scalar_lea.vmem %s1528_s16, 256  ;;  %p1530_p1 = scmp.lt.s32.totalorder %s1858_s23, %s1528_s16 }
  0x43   : > { %1405 = vmatpush3.bf16.msra.mxu0 %v1493_v8  ;;  %905 = vmatpush1.bf16.msra.mxu1 %v1332_v21  ;;  %v373_v31 = vld [vmem:[#allocation2 + $0x120] sm:$0xff]  ;;  %v374_v21 = vld [vmem:[#allocation2 + $0x128] sm:$0xff]  ;;  %p1526_p13 = pneg %p1525_p11  ;;  %p1531_p3 = scmp.lt.s32.totalorder %s1529_s8, %s1523_s30 }
  0x44   : > { %1406 = vmatprep.subr.bf16.mxu0 %v1612_v5  ;;  %906 = vmatprep.subr.bf16.mxu1 %v1341_v24  ;;  %v1357_v32 = vcombine.high %v369_v30, %v373_v31  ;;  %v1356_v33 = vcombine.low %v369_v30, %v373_v31  ;;  %v377_v34 = vld [vmem:[#allocation2 + $0x140] sm:$0xff]  ;;  %v1359_v23 = vcombine.high %v370_v20, %v374_v21  ;;  %v378_v24 = vld [vmem:[#allocation2 + $0x148] sm:$0xff] }
  0x45   : > { %v381_v35 = vld [vmem:[#allocation2 + $0x160] sm:$0xff]  ;;  %v1358_v14 = vcombine.low %v370_v20, %v374_v21  ;;  %v390_v30 = vld [vmem:[#allocation2 + $0x1a8] sm:$0xff]  ;;  %v364_v20 = vld [vmem:[#allocation2 + $0xd8] sm:$0xff]  ;;  %p1532_p5 = por %p1531_p3, %p1530_p1 }
  0x46   : > { %1490 = vset.pattern.permute.xlu1 %v1613_v7  ;;  %1489 = vset.pattern.permute.xlu0 %v1613_v7  ;;  %v1365_v36 = vcombine.high %v377_v34, %v381_v35  ;;  %v1364_v37 = vcombine.low %v377_v34, %v381_v35  ;;  %v326_v41 = vld [vmem:[%s1904_s1] sm:$0x7]  ;;  %v368_v21 = vld [vmem:[#allocation2 + $0xf8] sm:$0xff] }
  0x47   : > { %449 = vperm.xlu1 %1490, %v403_v3   ;;  %445 = vperm.xlu0 %1489, %v402_v2   ;;  %v417_v42 = vrot.slane %v326_v41, %v416_v40  ;;  %v1317_v48 = vld [vmem:[%s1905_s2] ss:$0 sm:$0xff]  ;;  %v439_v49 = vrot.slane %v326_v41, %v438_v43  ;;  %v455_v54 = vrot.slane %v326_v41, %v454_v47  ;;  %v346_v3 = vld [vmem:[#allocation2 + $0x48] sm:$0xff]  ;;  %p1533_p6 = pnand %p1532_p5, %p1526_p13 }
  0x48   : > { %1407 = vmatpush3.bf16.msra.mxu0 %v1494_v9  ;;  %907 = vmatpush1.bf16.msra.mxu1 %v1340_v25  ;;  %v1335_v8 = vcombine.high %v346_v3, %v350_v4  ;;  %v354_v9 = vld [vmem:[#allocation2 + $0x88] sm:$0xff]  ;;  %v1334_v11 = vcombine.low %v346_v3, %v350_v4  ;;  %v1366_v25 = vcombine.low %v378_v24, %v382_v12  ;;  %v385_v26 = vld [vmem:[#allocation2 + $0x180] sm:$0xff] }
  0x49   : > { %945 = vmatprep.subr.bf16.mxu0 %v1327_v19  ;;  %908 = vmatprep.subr.bf16.mxu1 %v1349_v28  ;;  %v1343_v13 = vcombine.high %v354_v9, %v358_v10  ;;  %v1342_v17 = vcombine.low %v354_v9, %v358_v10  ;;  %v1351_v19 = vcombine.high %v362_v15, %v366_v16  ;;  %v389_v27 = vld [vmem:[#allocation2 + $0x1a0] sm:$0xff]  ;;  %v386_v28 = vld [vmem:[#allocation2 + $0x188] sm:$0xff]  ;;  %v356_v9 = vld [vmem:[#allocation2 + $0x98] sm:$0xff] }
  0x4a   : > { %v1374_v31 = vcombine.low %v386_v28, %v390_v30  ;;  %v393_v34 = vld [vmem:[#allocation2 + $0x1c0] sm:$0xff]  ;;  %v360_v10 = vld [vmem:[#allocation2 + $0xb8] sm:$0xff] }
  0x4b   : > { %v397_v35 = vld [vmem:[#allocation2 + $0x1e0] sm:$0xff]  ;;  %v1347_v16 = vcombine.high %v356_v9, %v360_v10 }
  0x4c   : > { %909 = vmatpush1.bf16.msra.mxu1 %v1348_v29  ;;  %v1373_v29 = vcombine.high %v385_v26, %v389_v27 }
  0x4d   : > { %910 = vmatprep.subr.bf16.mxu1 %v1357_v32  ;;  %v1375_v32 = vcombine.high %v386_v28, %v390_v30  ;;  %v1354_v28 = vcombine.low %v364_v20, %v368_v21  ;;  %v379_v30 = vld [vmem:[#allocation2 + $0x150] sm:$0xff] }
  0x50   : > { %911 = vmatpush1.bf16.msra.mxu1 %v1356_v33  ;;  %v1372_v33 = vcombine.low %v385_v26, %v389_v27  ;;  %v376_v26 = vld [vmem:[#allocation2 + $0x138] sm:$0xff] }
  0x51   : > { %912 = vmatprep.subr.bf16.mxu1 %v1365_v36  ;;  %v394_v36 = vld [vmem:[#allocation2 + $0x1c8] sm:$0xff] }
  0x52   : > { %v1382_v41 = vcombine.low %v394_v36, %v398_v38 }
  0x54   : > { %913 = vmatpush1.bf16.msra.mxu1 %v1364_v37  ;;  %v1381_v37 = vcombine.high %v393_v34, %v397_v35 }
  0x55   : > { %914 = vmatprep.subr.bf16.mxu1 %v1373_v29 }
  0x58   : > { %915 = vmatpush1.bf16.msra.mxu1 %v1372_v33  ;;  %v384_v33 = vld [vmem:[#allocation2 + $0x178] sm:$0xff] }
  0x59   : > { %916 = vmatprep.subr.bf16.mxu1 %v1381_v37 }
  0xbd   : > { %v430_v44 = vpop.permute.xlu1 %429  ;;  %v407_v45 = vpop.permute.xlu0 %406 }
  0xbe   : > { %v418_v46 = vmul.f32 %v417_v42, %v407_v45  ;;  %v440_v57 = vmul.f32 %v439_v49, %v430_v44  ;;  %v1380_v44 = vcombine.low %v393_v34, %v397_v35  ;;  %v339_v45 = vld [vmem:[#allocation2 + $0x10] sm:$0xff] }
  0xc0   : > { %v426_v53 = vadd.f32 %v1317_v48, %v418_v46  ;;  %917 = vmatpush1.bf16.msra.mxu1 %v1380_v44  ;;  %v343_v46 = vld [vmem:[#allocation2 + $0x30] sm:$0xff]  ;;  %v392_v44 = vld [vmem:[#allocation2 + $0x1b8] sm:$0xff] }
  0xc1   : > { %v434_v50 = vpop.permute.xlu1 %433  ;;  %v412_v51 = vpop.permute.xlu0 %411 }
  0xc2   : > { %v419_v52 = vmul.f32 %v417_v42, %v412_v51  ;;  %v441_v55 = vmul.f32 %v439_v49, %v434_v50  ;;  %v442_v62 = vadd.f32 %v440_v57, %v426_v53  ;;  %v1383_v42 = vcombine.high %v394_v36, %v398_v38  ;;  %v344_v50 = vld [vmem:[#allocation2 + $0x38] sm:$0xff]  ;;  %v387_v38 = vld [vmem:[#allocation2 + $0x190] sm:$0xff] }
  0xc3   : > { %v1329_v49 = vcombine.high %v339_v45, %v343_v46  ;;  %v1328_v51 = vcombine.low %v339_v45, %v343_v46 }
  0xc4   : > { %v427_v56 = vadd.f32 %v1317_v48, %v419_v52  ;;  %v340_v48 = vld [vmem:[#allocation2 + $0x18] sm:$0xff] }
  0xc5   : > { %v1330_v52 = vcombine.low %v340_v48, %v344_v50  ;;  %v1331_v53 = vcombine.high %v340_v48, %v344_v50  ;;  %988 = vmatprep.subr.bf16.mxu1 %v1329_v49  ;;  %v395_v50 = vld [vmem:[#allocation2 + $0x1d0] sm:$0xff] }
  0xc6   : > { %v450_v58 = vpop.permute.xlu1 %449  ;;  %v443_v59 = vadd.f32 %v441_v55, %v427_v56  ;;  %v446_v60 = vpop.permute.xlu0 %445 }
  0xc7   : > { %v457_v61 = vmul.f32 %v455_v54, %v450_v58  ;;  %v456_v63 = vmul.f32 %v455_v54, %v446_v60  ;;  %v1318_v54 = vld [vmem:[%s1907_s4] ss:$0 sm:$0xff] }
  0xc9   : > { %v459_v0 = vadd.f32 %v457_v61, %v443_v59  ;;  %v458_v2 = vadd.f32 %v456_v63, %v442_v62  ;;  %v347_v61 = vld [vmem:[#allocation2 + $0x50] sm:$0xff]  ;;  %v348_v63 = vld [vmem:[#allocation2 + $0x58] sm:$0xff] }
  0xca   : > { %v351_v62 = vld [vmem:[#allocation2 + $0x70] sm:$0xff] }
  0xcb   : > { %v461_v5 = vmax.f32 %v459_v0, 0.0  ;;  %v460_v6 = vmax.f32 %v458_v2, 0.0  ;;  %v352_v0 = vld [vmem:[#allocation2 + $0x78] sm:$0xff] }
  0xcd   : > { %v462_v7 = vpack.c.bf16 %v461_v5, %v460_v6  ;;  %v1337_v5 = vcombine.high %v347_v61, %v351_v62  ;;  %v1339_v6 = vcombine.high %v348_v63, %v352_v0 }
  0xcf   : > { %1409 = vmatmul.mubr.msk.bf16.vlgmr.msra.gmra.mrb[0].mxu0 %vm493_vm1, %v462_v7  ;;  %v355_v7 = vld [vmem:[#allocation2 + $0x90] sm:$0xff] }
  0xd0   : > { %946 = vmatpush1.bf16.msra.mxu0 %v1326_v18  ;;  %977 = vmatprep.mubr.bf16.mxu0 %v1611_v1  ;;  %v1367_v18 = vcombine.high %v378_v24, %v382_v12  ;;  %v1355_v12 = vcombine.high %v364_v20, %v368_v21 }
  0xd1   : > { %947 = vmatprep.subr.bf16.mxu0 %v1335_v8  ;;  %v359_v8 = vld [vmem:[#allocation2 + $0xb0] sm:$0xff] }
  0xd2   : > { %v1345_v15 = vcombine.high %v355_v7, %v359_v8 }
  0xd4   : > { %948 = vmatpush1.bf16.msra.mxu0 %v1334_v11  ;;  %v1336_v11 = vcombine.low %v347_v61, %v351_v62  ;;  %v556_v61 = vsub.s32 3, %v1777_v39 }
  0xd5   : > { %949 = vmatprep.subr.bf16.mxu0 %v1343_v13  ;;  %v1338_v13 = vcombine.low %v348_v63, %v352_v0 }
  0xd8   : > { %950 = vmatpush1.bf16.msra.mxu0 %v1342_v17  ;;  %v363_v17 = vld [vmem:[#allocation2 + $0xd0] sm:$0xff] }
  0xd9   : > { %951 = vmatprep.subr.bf16.mxu0 %v1351_v19  ;;  %v367_v19 = vld [vmem:[#allocation2 + $0xf0] sm:$0xff] }
  0xda   : > { %v1353_v24 = vcombine.high %v363_v17, %v367_v19  ;;  %v1352_v27 = vcombine.low %v363_v17, %v367_v19 }
  0xdc   : > { %952 = vmatpush1.bf16.msra.mxu0 %v1350_v22  ;;  %v1344_v22 = vcombine.low %v355_v7, %v359_v8 }
  0xdd   : > { %953 = vmatprep.subr.bf16.mxu0 %v1359_v23  ;;  %v1346_v23 = vcombine.low %v356_v9, %v360_v10 }
  0xe0   : > { %954 = vmatpush1.bf16.msra.mxu0 %v1358_v14  ;;  %v371_v14 = vld [vmem:[#allocation2 + $0x110] sm:$0xff] }
  0xe1   : > { %955 = vmatprep.subr.bf16.mxu0 %v1367_v18  ;;  %v375_v18 = vld [vmem:[#allocation2 + $0x130] sm:$0xff] }
  0xe2   : > { %v1361_v29 = vcombine.high %v371_v14, %v375_v18  ;;  %v1360_v34 = vcombine.low %v371_v14, %v375_v18 }
  0xe4   : > { %956 = vmatpush1.bf16.msra.mxu0 %v1366_v25  ;;  %v372_v25 = vld [vmem:[#allocation2 + $0x118] sm:$0xff] }
  0xe5   : > { %957 = vmatprep.subr.bf16.mxu0 %v1375_v32  ;;  %v380_v32 = vld [vmem:[#allocation2 + $0x158] sm:$0xff]  ;;  %v1362_v35 = vcombine.low %v372_v25, %v376_v26 }
  0xe6   : > { %v1371_v37 = vcombine.high %v380_v32, %v384_v33  ;;  %v1370_v46 = vcombine.low %v380_v32, %v384_v33 }
  0xe8   : > { %958 = vmatpush1.bf16.msra.mxu0 %v1374_v31  ;;  %v383_v31 = vld [vmem:[#allocation2 + $0x170] sm:$0xff] }
  0xe9   : > { %959 = vmatprep.subr.bf16.mxu0 %v1383_v42  ;;  %v1369_v36 = vcombine.high %v379_v30, %v383_v31  ;;  %v388_v42 = vld [vmem:[#allocation2 + $0x198] sm:$0xff]  ;;  %v1368_v45 = vcombine.low %v379_v30, %v383_v31 }
  0xea   : > { %v1379_v49 = vcombine.high %v388_v42, %v392_v44 }
  0xec   : > { %960 = vmatpush1.bf16.msra.mxu0 %v1382_v41  ;;  %v391_v41 = vld [vmem:[#allocation2 + $0x1b0] sm:$0xff] }
  0xed   : > { %1031 = vmatprep.subr.bf16.mxu0 %v1331_v53  ;;  %v1377_v48 = vcombine.high %v387_v38, %v391_v41  ;;  %v400_v53 = vld [vmem:[#allocation2 + $0x1f8] sm:$0xff] }
 0x1a2   : > { %v531_v55 = vpop.f32.mrb[0].mxu0 }
 0x1a3   : > { %v532_v56 = vadd.f32 %v1318_v54, %v531_v55  ;;  %v1410_v57 = vpop.f32.mrb[1].mxu0  ;;  %v1378_v55 = vcombine.low %v388_v42, %v392_v44 }
 0x1a4   : > { %v534_v58 = vpop.f32.mrb[2].mxu0 }
 0x1a5   : > { %v535_v59 = vadd.f32 %v1318_v54, %v534_v58  ;;  %v1411_v60 = vpop.f32.mrb[3].mxu0  ;;  %v538_v2 = vmax.f32 %v532_v56, 0.0  ;;  %v1376_v54 = vcombine.low %v387_v38, %v391_v41 }
 0x1a6   : > { %v1812_v60 = vld [vmem:[%s1909_s6] sm:$0xff] }
 0x1a7   : > { %v539_v3 = vmax.f32 %v535_v59, 0.0  ;;  %v545_v62 = vrot.slane %v1812_v60, %v416_v40  ;;  %v553_v63 = vrot.slane %v1812_v60, %v454_v47  ;;  %v549_v0 = vrot.slane %v1812_v60, %v438_v43 }
 0x1a9   : > { %v1801_v4 = vpack.c.bf16 %v539_v3, %v538_v2  ;;  %v557_v2 = vrot.slane %v1812_v60, %v556_v61 }
 0x1ab   : > { %935 = vmatmul.mubr.bf16.vlgmr.msra.gmra.mrb[0].mxu1 %v1801_v4  ;;  %978 = vmatmul.mubr.bf16.vlgmr.msra.gmra.mrb[4].mxu0 %v1801_v4 }
 0x1ac   : > { %989 = vmatpush1.bf16.msra.mxu1 %v1328_v51  ;;  %1032 = vmatpush1.bf16.msra.mxu0 %v1330_v52  ;;  %v399_v51 = vld [vmem:[#allocation2 + $0x1f0] sm:$0xff]  ;;  %v396_v52 = vld [vmem:[#allocation2 + $0x1d8] sm:$0xff] }
 0x1ad   : > { %990 = vmatprep.subr.bf16.mxu1 %v1337_v5  ;;  %1033 = vmatprep.subr.bf16.mxu0 %v1339_v6  ;;  %v1385_v56 = vcombine.high %v395_v50, %v399_v51  ;;  %v1387_v57 = vcombine.high %v396_v52, %v400_v53  ;;  %v1384_v58 = vcombine.low %v395_v50, %v399_v51 }
 0x1ae   : > { %1020 = vmatprep.mubr.bf16.mxu1 %v1611_v1  ;;  %1063 = vmatprep.mubr.bf16.mxu0 %v1611_v1  ;;  %v1363_v1 = vcombine.high %v372_v25, %v376_v26  ;;  %v1386_v59 = vcombine.low %v396_v52, %v400_v53 }
 0x1b0   : > { %991 = vmatpush1.bf16.msra.mxu1 %v1336_v11  ;;  %1034 = vmatpush1.bf16.msra.mxu0 %v1338_v13 }
 0x1b1   : > { %992 = vmatprep.subr.bf16.mxu1 %v1345_v15  ;;  %1035 = vmatprep.subr.bf16.mxu0 %v1347_v16 }
 0x1b4   : > { %993 = vmatpush1.bf16.msra.mxu1 %v1344_v22  ;;  %1036 = vmatpush1.bf16.msra.mxu0 %v1346_v23 }
 0x1b5   : > { %994 = vmatprep.subr.bf16.mxu1 %v1353_v24  ;;  %1037 = vmatprep.subr.bf16.mxu0 %v1355_v12 }
 0x1b8   : > { %995 = vmatpush1.bf16.msra.mxu1 %v1352_v27  ;;  %1038 = vmatpush1.bf16.msra.mxu0 %v1354_v28 }
 0x1b9   : > { %996 = vmatprep.subr.bf16.mxu1 %v1361_v29  ;;  %1039 = vmatprep.subr.bf16.mxu0 %v1363_v1 }
 0x1bc   : > { %997 = vmatpush1.bf16.msra.mxu1 %v1360_v34  ;;  %1040 = vmatpush1.bf16.msra.mxu0 %v1362_v35  ;;  %v1615_v34 = vmov 1966171168  }
 0x1bd   : > { %998 = vmatprep.subr.bf16.mxu1 %v1369_v36  ;;  %1041 = vmatprep.subr.bf16.mxu0 %v1371_v37  ;;  %v1160_v35 = vunpack.c.l.s4 %v1615_v34 }
 0x1c0   : > { %999 = vmatpush1.bf16.msra.mxu1 %v1368_v45  ;;  %1042 = vmatpush1.bf16.msra.mxu0 %v1370_v46 }
 0x1c1   : > { %1000 = vmatprep.subr.bf16.mxu1 %v1377_v48  ;;  %1043 = vmatprep.subr.bf16.mxu0 %v1379_v49  ;;  %v1161_v48 = vunpack.c.0.s8 %v1160_v35 }
 0x1c4   : > { %1001 = vmatpush1.bf16.msra.mxu1 %v1376_v54  ;;  %1044 = vmatpush1.bf16.msra.mxu0 %v1378_v55 }
 0x1c5   : > { %1002 = vmatprep.subr.bf16.mxu1 %v1385_v56  ;;  %1045 = vmatprep.subr.bf16.mxu0 %v1387_v57  ;;  %v1826_v57 = vsub.s32 %v1161_v48, %v1777_v39 }
 0x1c8   : > { %1003 = vmatpush1.bf16.msra.mxu1 %v1384_v58  ;;  %1046 = vmatpush1.bf16.msra.mxu0 %v1386_v59 }
 0x1cb   : > { %1021 = vmatmul.mubr.bf16.vlgmr.msra.gmra.mrb[4].mxu1 %v1801_v4  ;;  %1064 = vmatmul.mubr.bf16.vlgmr.msra.gmra.mrb[8].mxu0 %v1801_v4 }
 0x27e   : > { %v936_v3 = vpop.f32.mrb[0].mxu1  ;;  %v979_v4 = vpop.f32.mrb[4].mxu0 }
 0x27f   : > { %v937_v5 = vadd.f32 %v936_v3, %v545_v62  ;;  %v980_v6 = vadd.f32 %v979_v4, %v553_v63  ;;  %v938_v7 = vpop.f32.mrb[1].mxu1  ;;  %v981_v8 = vpop.f32.mrb[5].mxu0  ;;  %v564_v4 = vsub.s32 5, %v1777_v39 }
 0x280   : > { %v939_v9 = vadd.f32 %v938_v7, %v549_v0  ;;  %v982_v10 = vadd.f32 %v981_v8, %v557_v2  ;;  %v940_v11 = vpop.f32.mrb[2].mxu1  ;;  %v983_v40 = vpop.f32.mrb[6].mxu0 }
 0x281   : > { %v941_v13 = vadd.f32 %v940_v11, %v545_v62  ;;  %v984_v15 = vadd.f32 %v983_v40, %v553_v63  ;;  %v942_v16 = vpop.f32.mrb[3].mxu1  ;;  %v985_v47 = vpop.f32.mrb[7].mxu0  ;;  %v1074_v20 = vmax.f32 %v937_v5, 0.0  ;;  %v1076_v43 = vmax.f32 %v980_v6, 0.0 }
 0x282   : > { %v943_v17 = vadd.f32 %v942_v16, %v549_v0  ;;  %v986_v19 = vadd.f32 %v985_v47, %v557_v2  ;;  %v1075_v23 = vmax.f32 %v939_v9, 0.0  ;;  %v1077_v24 = vmax.f32 %v982_v10, 0.0 }
 0x283   : > { %v1082_v21 = vmax.f32 %v941_v13, 0.0  ;;  %v1084_v22 = vmax.f32 %v984_v15, 0.0  ;;  %v560_v0 = vsub.s32 4, %v1777_v39  ;;  %v568_v2 = vsub.s32 6, %v1777_v39 }
 0x284   : > { %v1083_v12 = vmax.f32 %v943_v17, 0.0  ;;  %v1085_v14 = vmax.f32 %v986_v19, 0.0  ;;  %v572_v5 = vsub.s32 7, %v1777_v39  ;;  %v565_v8 = vrot.slane %v1812_v60, %v564_v4 }
 0x285   : > { %v1090_v18 = vmax.f32 %v1074_v20, %v1082_v21  ;;  %v1104_v25 = vmax.f32 %v1076_v43, %v1084_v22  ;;  %v561_v6 = vrot.slane %v1812_v60, %v560_v0  ;;  %v569_v7 = vrot.slane %v1812_v60, %v568_v2 }
 0x286   : > { %v1097_v26 = vmax.f32 %v1075_v23, %v1083_v12  ;;  %v1111_v27 = vmax.f32 %v1077_v24, %v1085_v14  ;;  %v573_v9 = vrot.slane %v1812_v60, %v572_v5 }
 0x287   : > { %v1091_v28 = vrot.slane %v1090_v18, 4  ;;  %v1105_v29 = vrot.slane %v1104_v25, 4 }
 0x288   : > { %v1098_v1 = vrot.slane %v1097_v26, 4  ;;  %v1112_v30 = vrot.slane %v1111_v27, 4 }
 0x289   : > { %v1092_v31 = vmax.f32 %v1090_v18, %v1091_v28  ;;  %v1106_v32 = vmax.f32 %v1104_v25, %v1105_v29 }
 0x28a   : > { %v1099_v33 = vmax.f32 %v1097_v26, %v1098_v1  ;;  %v1113_v36 = vmax.f32 %v1111_v27, %v1112_v30 }
 0x28b   : > { %v1093_v37 = vrot.slane %v1092_v31, 2  ;;  %v1107_v38 = vrot.slane %v1106_v32, 2 }
 0x28c   : > { %v1100_v41 = vrot.slane %v1099_v33, 2  ;;  %v1114_v42 = vrot.slane %v1113_v36, 2 }
 0x28d   : > { %v1094_v44 = vmax.f32 %v1092_v31, %v1093_v37  ;;  %v1108_v45 = vmax.f32 %v1106_v32, %v1107_v38 }
 0x28e   : > { %v1101_v46 = vmax.f32 %v1099_v33, %v1100_v41  ;;  %v1115_v49 = vmax.f32 %v1113_v36, %v1114_v42 }
 0x28f   : > { %v1095_v50 = vrot.slane %v1094_v44, 1  ;;  %v1109_v51 = vrot.slane %v1108_v45, 1 }
 0x290   : > { %v1102_v52 = vrot.slane %v1101_v46, 1  ;;  %v1116_v53 = vrot.slane %v1115_v49, 1 }
 0x291   : > { %v1096_v54 = vmax.f32 %v1094_v44, %v1095_v50  ;;  %v1110_v55 = vmax.f32 %v1108_v45, %v1109_v51 }
 0x292   : > { %v1103_v56 = vmax.f32 %v1101_v46, %v1102_v52  ;;  %v1117_v58 = vmax.f32 %v1115_v49, %v1116_v53 }
 0x294   : > { %v1155_v59 = vcombine.low %v1096_v54, %v1103_v56  ;;  %v1156_v61 = vcombine.low %v1110_v55, %v1117_v58 }
 0x296   : > { %v1829_v62 = vrot.slane %v1155_v59, %v1826_v57  ;;  %v1832_v63 = vrot.slane %v1156_v61, %v1826_v57 }
 0x298   : > { %v1187_v3 = vcombine.low %v1829_v62, %v1832_v63 }
 0x29e   : > { %v1022_v10 = vpop.f32.mrb[4].mxu1  ;;  %v1065_v11 = vpop.f32.mrb[8].mxu0 }
 0x29f   : > { %v1023_v40 = vadd.f32 %v1022_v10, %v561_v6  ;;  %v1066_v13 = vadd.f32 %v1065_v11, %v569_v7  ;;  %v1024_v15 = vpop.f32.mrb[5].mxu1  ;;  %v1067_v16 = vpop.f32.mrb[9].mxu0 }
 0x2a0   : > { %v1025_v47 = vadd.f32 %v1024_v15, %v565_v8  ;;  %v1068_v17 = vadd.f32 %v1067_v16, %v573_v9  ;;  %v1026_v19 = vpop.f32.mrb[6].mxu1  ;;  %v1069_v20 = vpop.f32.mrb[10].mxu0 }
 0x2a1   : > { %v1027_v43 = vadd.f32 %v1026_v19, %v561_v6  ;;  %v1070_v39 = vadd.f32 %v1069_v20, %v569_v7  ;;  %v1028_v21 = vpop.f32.mrb[7].mxu1  ;;  %v1071_v22 = vpop.f32.mrb[11].mxu0  ;;  %v1078_v12 = vmax.f32 %v1023_v40, 0.0  ;;  %v1080_v14 = vmax.f32 %v1066_v13, 0.0 }
 0x2a2   : > { %v1029_v23 = vadd.f32 %v1028_v21, %v565_v8  ;;  %v1072_v24 = vadd.f32 %v1071_v22, %v573_v9  ;;  %v1079_v25 = vmax.f32 %v1025_v47, 0.0  ;;  %v1081_v26 = vmax.f32 %v1068_v17, 0.0 }
 0x2a3   : > { %v1086_v18 = vmax.f32 %v1027_v43, 0.0  ;;  %v1088_v60 = vmax.f32 %v1070_v39, 0.0  ;;  %v1195_v7 = vrot.slane %v1187_v3, %v1826_v57 }
 0x2a4   : > { %v1087_v27 = vmax.f32 %v1029_v23, 0.0  ;;  %v1089_v28 = vmax.f32 %v1072_v24, 0.0 }
 0x2a5   : > { %v1118_v29 = vmax.f32 %v1078_v12, %v1086_v18  ;;  %v1132_v1 = vmax.f32 %v1080_v14, %v1088_v60 }
 0x2a6   : > { %v1125_v30 = vmax.f32 %v1079_v25, %v1087_v27  ;;  %v1139_v31 = vmax.f32 %v1081_v26, %v1089_v28 }
 0x2a7   : > { %v1119_v32 = vrot.slane %v1118_v29, 4  ;;  %v1133_v33 = vrot.slane %v1132_v1, 4 }
 0x2a8   : > { %v1126_v34 = vrot.slane %v1125_v30, 4  ;;  %v1140_v35 = vrot.slane %v1139_v31, 4 }
 0x2a9   : > { %v1120_v36 = vmax.f32 %v1118_v29, %v1119_v32  ;;  %v1134_v37 = vmax.f32 %v1132_v1, %v1133_v33 }
 0x2aa   : > { %v1127_v38 = vmax.f32 %v1125_v30, %v1126_v34  ;;  %v1141_v41 = vmax.f32 %v1139_v31, %v1140_v35 }
 0x2ab   : > { %v1121_v42 = vrot.slane %v1120_v36, 2  ;;  %v1135_v44 = vrot.slane %v1134_v37, 2 }
 0x2ac   : > { %v1128_v45 = vrot.slane %v1127_v38, 2  ;;  %v1142_v46 = vrot.slane %v1141_v41, 2 }
 0x2ad   : > { %v1122_v48 = vmax.f32 %v1120_v36, %v1121_v42  ;;  %v1136_v49 = vmax.f32 %v1134_v37, %v1135_v44 }
 0x2ae   : > { %v1129_v50 = vmax.f32 %v1127_v38, %v1128_v45  ;;  %v1143_v51 = vmax.f32 %v1141_v41, %v1142_v46 }
 0x2af   : > { %v1123_v52 = vrot.slane %v1122_v48, 1  ;;  %v1137_v53 = vrot.slane %v1136_v49, 1 }
 0x2b0   : > { %v1130_v54 = vrot.slane %v1129_v50, 1  ;;  %v1144_v55 = vrot.slane %v1143_v51, 1 }
 0x2b1   : > { %v1124_v56 = vmax.f32 %v1122_v48, %v1123_v52  ;;  %v1138_v58 = vmax.f32 %v1136_v49, %v1137_v53 }
 0x2b2   : > { %v1131_v59 = vmax.f32 %v1129_v50, %v1130_v54  ;;  %v1145_v61 = vmax.f32 %v1143_v51, %v1144_v55 }
 0x2b4   : > { %v1157_v0 = vcombine.low %v1124_v56, %v1131_v59  ;;  %v1158_v2 = vcombine.low %v1138_v58, %v1145_v61 }
 0x2b6   : > { %v1179_v4 = vrot.slane %v1157_v0, %v1826_v57  ;;  %v1186_v5 = vrot.slane %v1158_v2, %v1826_v57 }
 0x2b8   : > { %v1188_v6 = vcombine.low %v1179_v4, %v1186_v5 }
 0x2ba   : > { %v1202_v8 = vrot.slane %v1188_v6, %v1826_v57 }
 0x2bc   : > { %v1203_v9 = vcombine.low %v1195_v7, %v1202_v8 }
 0x2be   : > { %1206 = vst [vmem:[%s309_s21] sm:$0xff] %v1203_v9 }
 0x2bf   : > { %1536 = shalt.err (!%p1533_p6)
}
 0x2c0   : > { %s1537_s10 = scalar_lea.hbm %s1856_s15, 128  ;;  %s1541_s20 = scalar_lea.hbm %s1910_s7, 256 }
 0x2c1   : > { %p1538_p7 = scmp.ne.s32.totalorder %s1856_s15, %s1537_s10  ;;  %p1542_p0 = scmp.lt.u32.totalorder %s1856_s15, %s1910_s7 }
 0x2c2   : > { %p1543_p2 = scmp.lt.u32.totalorder %s1541_s20, %s1537_s10  ;;  %p1545_p8 = scmp.lt.u32.totalorder %s1537_s10, %s1856_s15 }
 0x2c3   : > { %p1539_p9 = pnand %p1538_p7, %p1922_p10 }
 0x2c4   : > { %p1544_p4 = por %p1543_p2, %p1542_p0 }
 0x2c5   : > { %p1540_p12 = pneg %p1539_p9 }
 0x2c6   : > { %p1546_p11 = por %p1545_p8, %p1544_p4 }
 0x2c8   : > { %p1547_p13 = pnand %p1546_p11, %p1540_p12 }
 0x2ca   : > { %1550 = shalt.err (!%p1547_p13)
}
 0x2cb   : > { %1416 = dma.vmem_to_hbm [thread:$0]  (%p1922_p10), %s1858_s23, 128, %s1856_s15, %s1208_s22  }
 0x2cc PF: > { %p1428_p1 = scmp.ge.s32.totalorder %s1605_s29, 2  ;;  %s1234_s18 = sand.u32 1, %s1585_s24  }
 0x2cd   : > { %p1923_p3 = scmp.ne.s32.totalorder %s1916_s13, 0  ;;  %s1235_s30 = scalar_lea.sflag [#allocation4], %s1234_s18 }
 0x2cf   : > { %p1423_p5 = pnand %p1428_p1, %p1923_p3 }
 0x2d1   : > { %1580 = dma.done.wait (!%p1423_p5), %s1235_s30, 128  }
 0x2d2   : > { %1582 = vsyncadd (!%p1423_p5), %s1235_s30, 4294967168  ;;  %s21_s29 = sadd.s32 1, %s1605_s29   ;;  %s1924_s24 = smov %s1589_s25 }
 0x2d3   : > { %p18_p6 = scmp.ge.s32.totalorder %s21_s29, 4   ;;  %s1925_s25 = smov %s1593_s26 }
 0x2d4   : > { %s1926_s26 = smov %s1710_s14  ;;  %s1927_s27 = smov %s1601_s28 }
 0x2d5   : > { %s1928_s28 = smov %s1930_s9  ;;  %20 = sbr.rel (!%p18_p6) target bundleno = 5 (0x5), region = 92 }
 0x2dc   :  { %1240 = vsyncpa [#allocation3], 1 }
 0x2dd   :  { %1242 = vsyncpa [#allocation3 + $0x1], 1 }
 0x2de   :  { %1243 = vsyncpa [#allocation4], 1 }
 0x2df   :  { %1245 = vsyncpa [#allocation4 + $0x1], 1 }

</bundles_post_ra>
